<compile_context>
chip_gen: v7x
topology: tpu7x:2x2x1
jax: 0.10.0
libtpu: 0.0.40
codegen_flags: <defaults>
</compile_context>

<pallas_src>
import functools

import jax
import jax.numpy as jnp
import numpy as np
from jax.experimental import pallas as pl
from jax.experimental.pallas import tpu as pltpu


def _faster_crn_kernel(obj_ref, cond_ref, wa_ref, ba_ref, wfg_ref, wfc_ref,
                       bf_ref, gamma_ref, beta_ref, out_ref, *,
                       spl_resolution, ln_eps, approx_recip, compute_dtype,
                       weights_resident):
    t = pl.program_id(1)
    # Resident weights: full-T block, pick slice t. Streaming: per-t block, slice 0.
    widx = t if weights_resident else 0

    obj = obj_ref[...]            # (bb, N, D) f32 or bf16
    cond = cond_ref[...]          # (bb, 1, D) f32
    wa = wa_ref[widx]             # (D, C)   assignment_fc weight, pre-transposed
    ba = ba_ref[widx]             # (1, C)   assignment_fc bias (f32)
    wfg = wfg_ref[widx]           # (D, D)   k_objects_fusion weight, g half (in,out)
    wfc = wfc_ref[widx]           # (D, D)   k_objects_fusion weight, cond half
    bf = bf_ref[widx]             # (1, D)   k_objects_fusion bias (f32)
    gamma = gamma_ref[...]        # (1, D)   LayerNorm weight
    beta = beta_ref[...]          # (1, D)   LayerNorm bias

    bb, N, D = obj.shape
    C = wa.shape[1]

    obj_c = obj.astype(compute_dtype)

    # ---- NetRVlad assignment: (bb*N, D) @ (D, C) on the MXU; softmax over C ----
    logits = jax.lax.dot_general(obj_c.reshape(bb * N, D), wa,
                                 (((1,), (0,)), ((), ())),
                                 preferred_element_type=jnp.float32)
    logits = logits.reshape(bb, N, C) + ba.reshape(1, 1, C)
    logits = logits - jnp.max(logits, axis=-1, keepdims=True)
    e = jnp.exp(logits)
    a = e / jnp.sum(e, axis=-1, keepdims=True)          # exact f32 softmax divide

    # ---- normalize assignments BEFORE aggregation (on (bb,N,C), N << D) ----------
    a_sum = jnp.sum(a, axis=1, keepdims=True)           # (bb, 1, C), > 0
    if approx_recip:
        a_norm = a * pl.reciprocal(a_sum, approx=True)  # EUP slot
    else:
        a_norm = a / a_sum

    # ---- soft aggregation einsum('bnc,bnd->bcd') as a batched MXU contraction ----
    g = jax.lax.dot_general(a_norm.astype(compute_dtype), obj_c,
                            (((1,), (1,)), ((0,), (0,))),
                            preferred_element_type=jnp.float32)     # (bb, C, D)

    # ---- cat(g, cond) -> Linear(2D, D), weight pre-split so no concat is built ----
    hg = jax.lax.dot_general(g.astype(compute_dtype).reshape(bb * C, D), wfg,
                             (((1,), (0,)), ((), ())),
                             preferred_element_type=jnp.float32).reshape(bb, C, D)
    hc = jax.lax.dot_general(cond.astype(compute_dtype), wfc,
                             (((2,), (0,)), ((), ())),
                             preferred_element_type=jnp.float32)    # (bb, 1, D)
    h = hg + hc + bf.reshape(1, 1, D)

    # ELU (alpha = 1), f32.
    h = jnp.where(h > 0, h, jnp.exp(jnp.minimum(h, 0.0)) - 1.0)

    # LayerNorm over the feature dim (biased variance, eps = 1e-5 as in PyTorch).
    mu = jnp.mean(h, axis=-1, keepdims=True)
    var = jnp.mean((h - mu) * (h - mu), axis=-1, keepdims=True)
    hn = (h - mu) * jax.lax.rsqrt(var + ln_eps)
    hn = hn * gamma.reshape(1, 1, D) + beta.reshape(1, 1, D)

    # ---- p_agg: accumulate over T in the resident output; scale once at the end ----
    @pl.when(t == 0)
    def _():
        out_ref[...] = jnp.zeros_like(out_ref)

    out_ref[...] += hn.astype(out_ref.dtype)

    @pl.when(t == spl_resolution - 1)
    def _():
        out_ref[...] *= jnp.float32(1.0 / spl_resolution)


def _vmem_capacity_bytes():
    """Physical VMEM per core; conservative (v7x-sized) fallback if query fails."""
    try:
        return int(pltpu.get_tpu_info().vmem_capacity_bytes)
    except Exception:
        return 64 << 20


def faster_crn_forward(object_list, cond_feat, params, *, block_b=None,
                       use_bf16_matmul=True, approx_recip=None,
                       weights_resident=None):
    """Pallas forward for FasterCRN (gating=False, NetRVlad aggregation)."""
    B, N, D = object_list.shape
    T, C, _ = params["wa"].shape
    if approx_recip is None:
        approx_recip = use_bf16_matmul
    compute_dtype = jnp.bfloat16 if use_bf16_matmul else jnp.float32
    f32b, wb = 4, jnp.dtype(compute_dtype).itemsize

    # Host-side, one-time weight plumbing: transpose so the contraction (input) dim
    # is leading on the MXU RHS, split the fusion weight into g / cond halves (the
    # concat is never materialised), optionally store streamed tensors as bf16.
    wa_t = jnp.transpose(params["wa"], (0, 2, 1)).astype(compute_dtype)             # (T, D, C)
    wfg_t = jnp.transpose(params["wf"][:, :, :D], (0, 2, 1)).astype(compute_dtype)  # (T, D, D)
    wfc_t = jnp.transpose(params["wf"][:, :, D:], (0, 2, 1)).astype(compute_dtype)  # (T, D, D)
    ba, bf = params["ba"], params["bf"]                                             # f32
    obj = object_list.astype(compute_dtype) if use_bf16_matmul else object_list
    obj_ib = jnp.dtype(obj.dtype).itemsize
    cond3 = cond_feat[:, None, :]                                                   # (B, 1, D)

    # ---- VMEM budget (with headroom for Mosaic scratch / semaphores) ----
    phys = _vmem_capacity_bytes()
    usable = int(phys * 0.80)        # ~51 MiB on v7x (64), ~102 MiB on v5e/v6e (128)

    w_bytes_step = D * C * wb + C * f32b + 2 * D * D * wb + D * f32b
    w_bytes_full = T * w_bytes_step
    if weights_resident is None:
        # Keep resident weights (x2 for buffering) to <= 1/4 of the usable budget.
        weights_resident = 2 * w_bytes_full <= usable // 4

    def vmem_estimate(bb):
        w = w_bytes_full if weights_resident else w_bytes_step
        blocks = (bb * N * D * obj_ib          # object_list block
                  + bb * D * f32b              # cond block
                  + w                          # weights + biases
                  + 2 * D * f32b               # gamma + beta
                  + bb * C * D * f32b)         # resident output block
        io = 2 * blocks                        # double-buffered windows
        # In-kernel live temporaries: logits/a/a_norm (bb*N*C), ~6 live (bb,C,D)
        # f32 values (g, hg, hc-broadcast, h, hn, acc write), obj casts (bb*N*D).
        tmp = (3 * bb * N * C * f32b
               + 6 * bb * C * D * f32b
               + 2 * bb * N * D * f32b)
        return io + tmp

    # ---- block_b heuristic ----
    if block_b is None:
        divisors = [d for d in range(1, B + 1) if B % d == 0]
        # keep >= 2 batch blocks when possible so v7x's two TCs can split the axis
        cands = [d for d in divisors if 2 * d <= B] or divisors
        # smallest block_b that fills one 256-wide MXU tile in the fusion matmul
        full = [d for d in cands if d * C >= 256]
        block_b = min(full) if full else max(cands)
        while block_b > 1 and vmem_estimate(block_b) > usable:
            smaller = [d for d in divisors if d < block_b]
            block_b = max(smaller) if smaller else 1
    assert B % block_b == 0, "batch must be divisible by block_b"

    vmem_limit = min(max(vmem_estimate(block_b) + (8 << 20), 32 << 20), usable)

    kernel = functools.partial(
        _faster_crn_kernel, spl_resolution=T, ln_eps=1e-5,
        approx_recip=approx_recip, compute_dtype=compute_dtype,
        weights_resident=weights_resident)

    if weights_resident:
        # Constant block index => fetched exactly once per kernel launch.
        w_specs = [
            pl.BlockSpec((T, D, C), lambda b, t: (0, 0, 0)),   # wa^T  (T, D, C)
            pl.BlockSpec((T, 1, C), lambda b, t: (0, 0, 0)),   # ba    (T, 1, C)
            pl.BlockSpec((T, D, D), lambda b, t: (0, 0, 0)),   # wf g-half^T
            pl.BlockSpec((T, D, D), lambda b, t: (0, 0, 0)),   # wf cond-half^T
            pl.BlockSpec((T, 1, D), lambda b, t: (0, 0, 0)),   # bf    (T, 1, D)
        ]
    else:
        # Fallback (large T*D*D): stream one resolution slice per inner grid step.
        w_specs = [
            pl.BlockSpec((1, D, C), lambda b, t: (t, 0, 0)),
            pl.BlockSpec((1, 1, C), lambda b, t: (t, 0, 0)),
            pl.BlockSpec((1, D, D), lambda b, t: (t, 0, 0)),
            pl.BlockSpec((1, D, D), lambda b, t: (t, 0, 0)),
            pl.BlockSpec((1, 1, D), lambda b, t: (t, 0, 0)),
        ]

    return pl.pallas_call(
        kernel,
        out_shape=jax.ShapeDtypeStruct((B, C, D), jnp.float32),
        grid_spec=pltpu.PrefetchScalarGridSpec(
            num_scalar_prefetch=0,
            grid=(B // block_b, T),                   # (parallel batch, reduction T)
            in_specs=[
                pl.BlockSpec((block_b, N, D), lambda b, t: (b, 0, 0)),   # object_list
                pl.BlockSpec((block_b, 1, D), lambda b, t: (b, 0, 0)),   # cond_feat
                *w_specs,
                pl.BlockSpec((1, D), lambda b, t: (0, 0)),               # ln gamma
                pl.BlockSpec((1, D), lambda b, t: (0, 0)),               # ln beta
            ],
            out_specs=pl.BlockSpec((block_b, C, D), lambda b, t: (b, 0, 0)),
        ),
        compiler_params=pltpu.CompilerParams(
            dimension_semantics=("parallel", "arbitrary"),
            vmem_limit_bytes=vmem_limit),
    )(obj, cond3, wa_t, ba, wfg_t, wfc_t, bf, params["gamma"], params["beta"])


def faster_crn_reference(object_list, cond_feat, params):
    """Pure-JAX reference mirroring the PyTorch module (gating=False)."""
    B, N, D = object_list.shape
    T, C, _ = params["wa"].shape
    with jax.default_matmul_precision("highest"):
        feats = []
        for t in range(T):
            wa, ba = params["wa"][t], params["ba"][t, 0]
            wf, bf = params["wf"][t], params["bf"][t, 0]
            logits = object_list @ wa.T + ba
            a = jax.nn.softmax(logits, axis=-1)                     # (B, N, C)
            a_x = jnp.einsum("bnc,bnd->bcd", a, object_list)        # (B, C, D)
            g = a_x / jnp.sum(a, axis=1)[..., None]
            cond_rep = jnp.broadcast_to(cond_feat[:, None, :], (B, C, D))
            h = jnp.concatenate([g, cond_rep], axis=-1) @ wf.T + bf
            h = jax.nn.elu(h)
            mu = h.mean(-1, keepdims=True)
            var = ((h - mu) ** 2).mean(-1, keepdims=True)
            h = (h - mu) / jnp.sqrt(var + 1e-5)
            h = h * params["gamma"][0] + params["beta"][0]
            feats.append(h)
        return jnp.mean(jnp.stack(feats, axis=1), axis=1)


def init_params(key, module_dim, max_subset_size, spl_resolution):
    """Deterministic init mimicking nn.Linear defaults (uniform +/- 1/sqrt(fan_in))."""
    D, C, T = module_dim, max_subset_size, spl_resolution
    k_wa, k_ba, k_wf, k_bf = jax.random.split(key, 4)
    bound_a = 1.0 / np.sqrt(D)
    bound_f = 1.0 / np.sqrt(2 * D)
    return {
        "wa": jax.random.uniform(k_wa, (T, C, D), jnp.float32, -bound_a, bound_a),
        "ba": jax.random.uniform(k_ba, (T, 1, C), jnp.float32, -bound_a, bound_a),
        "wf": jax.random.uniform(k_wf, (T, D, 2 * D), jnp.float32, -bound_f, bound_f),
        "bf": jax.random.uniform(k_bf, (T, 1, D), jnp.float32, -bound_f, bound_f),
        "gamma": jnp.ones((1, D), jnp.float32),
        "beta": jnp.zeros((1, D), jnp.float32),
    }


if __name__ == "__main__":
    # Small shapes: batch=2, num_objects=8, module_dim=128 (lane-dense feature dim),
    # max_subset_size (clusters)=8, spl_resolution=2, gating=False.
    B, N, D, C, T = 2, 8, 128, 8, 2
    # TODO(synk): gating=True and max_subset_size==1 (plain-mean g_agg) branches are
    # not exercised here; only the default NetRVlad / no-gating path is implemented.

    key = jax.random.PRNGKey(0)
    k_obj, k_cond, k_par = jax.random.split(key, 3)
    object_list = jax.random.normal(k_obj, (B, N, D), jnp.float32)
    cond_feat = jax.random.normal(k_cond, (B, D), jnp.float32)
    params = init_params(k_par, D, C, T)

    ref = faster_crn_reference(object_list, cond_feat, params)

    # Precise path: f32 MXU operands, exact divides (tight tolerance).
    out_f32 = faster_crn_forward(object_list, cond_feat, params,
                                 use_bf16_matmul=False)
    out_f32 = jax.block_until_ready(out_f32)
    np.testing.assert_allclose(np.asarray(out_f32), np.asarray(ref),
                               rtol=2e-4, atol=2e-4)

    # Fast path: bf16 MXU operands / bf16 obj in HBM (f32 accumulation) + EUP
    # approx reciprocal on the NetRVlad a_sum divide.
    out_fast = faster_crn_forward(object_list, cond_feat, params,
                                  use_bf16_matmul=True)
    out_fast = jax.block_until_ready(out_fast)
    np.testing.assert_allclose(np.asarray(out_fast), np.asarray(ref),
                               rtol=5e-2, atol=5e-2)

    print("KERNEL_OK")
</pallas_src>

<mosaic_0001>
module attributes {stable_mosaic.version = 11 : i64} {
  func.func @_faster_crn_kernel(%arg0: i32, %arg1: i32, %arg2: memref<1x8x128xf32, #tpu.memory_space<vmem>>, %arg3: memref<1x1x128xf32, #tpu.memory_space<vmem>>, %arg4: memref<2x128x8xf32, #tpu.memory_space<vmem>>, %arg5: memref<2x1x8xf32, #tpu.memory_space<vmem>>, %arg6: memref<2x128x128xf32, #tpu.memory_space<vmem>>, %arg7: memref<2x128x128xf32, #tpu.memory_space<vmem>>, %arg8: memref<2x1x128xf32, #tpu.memory_space<vmem>>, %arg9: memref<1x128xf32, #tpu.memory_space<vmem>>, %arg10: memref<1x128xf32, #tpu.memory_space<vmem>>, %arg11: memref<1x8x128xf32, #tpu.memory_space<vmem>>) attributes {dimension_semantics = [#tpu.dimension_semantics<parallel>, #tpu.dimension_semantics<arbitrary>], iteration_bounds = array<i64: 2, 2>, scalar_prefetch = 0 : i64, scratch_operands = 0 : i64, tpu.core_type = #tpu.core_type<tc>, window_params = [{transform_indices = @transform_0, window_bounds = array<i64: 1, 8, 128>}, {transform_indices = @transform_1, window_bounds = array<i64: 1, 1, 128>}, {pipeline_mode = #tpu.pipeline_mode<synchronous>, transform_indices = @transform_2, window_bounds = array<i64: 2, 128, 8>}, {pipeline_mode = #tpu.pipeline_mode<synchronous>, transform_indices = @transform_3, window_bounds = array<i64: 2, 1, 8>}, {pipeline_mode = #tpu.pipeline_mode<synchronous>, transform_indices = @transform_4, window_bounds = array<i64: 2, 128, 128>}, {pipeline_mode = #tpu.pipeline_mode<synchronous>, transform_indices = @transform_5, window_bounds = array<i64: 2, 128, 128>}, {pipeline_mode = #tpu.pipeline_mode<synchronous>, transform_indices = @transform_6, window_bounds = array<i64: 2, 1, 128>}, {pipeline_mode = #tpu.pipeline_mode<synchronous>, transform_indices = @transform_7, window_bounds = array<i64: 1, 128>}, {pipeline_mode = #tpu.pipeline_mode<synchronous>, transform_indices = @transform_8, window_bounds = array<i64: 1, 128>}, {transform_indices = @transform_9, window_bounds = array<i64: 1, 8, 128>}]} {
    %c0 = arith.constant 0 : index
    %c0_0 = arith.constant 0 : index
    %c0_1 = arith.constant 0 : index
    %0 = vector.load %arg2[%c0, %c0_0, %c0_1] : memref<1x8x128xf32, #tpu.memory_space<vmem>>, vector<1x8x128xf32>
    %c0_2 = arith.constant 0 : index
    %c0_3 = arith.constant 0 : index
    %c0_4 = arith.constant 0 : index
    %1 = vector.load %arg3[%c0_2, %c0_3, %c0_4] : memref<1x1x128xf32, #tpu.memory_space<vmem>>, vector<1x1x128xf32>
    %2 = arith.index_cast %arg1 : i32 to index
    %c0_5 = arith.constant 0 : index
    %c0_6 = arith.constant 0 : index
    %3 = vector.load %arg4[%2, %c0_5, %c0_6] : memref<2x128x8xf32, #tpu.memory_space<vmem>>, vector<1x128x8xf32>
    %4 = vector.shape_cast %3 : vector<1x128x8xf32> to vector<128x8xf32>
    %5 = arith.index_cast %arg1 : i32 to index
    %c0_7 = arith.constant 0 : index
    %c0_8 = arith.constant 0 : index
    %6 = vector.load %arg5[%5, %c0_7, %c0_8] : memref<2x1x8xf32, #tpu.memory_space<vmem>>, vector<1x1x8xf32>
    %7 = vector.shape_cast %6 : vector<1x1x8xf32> to vector<1x8xf32>
    %8 = arith.index_cast %arg1 : i32 to index
    %c0_9 = arith.constant 0 : index
    %c0_10 = arith.constant 0 : index
    %9 = vector.load %arg6[%8, %c0_9, %c0_10] : memref<2x128x128xf32, #tpu.memory_space<vmem>>, vector<1x128x128xf32>
    %10 = vector.shape_cast %9 : vector<1x128x128xf32> to vector<128x128xf32>
    %11 = arith.index_cast %arg1 : i32 to index
    %c0_11 = arith.constant 0 : index
    %c0_12 = arith.constant 0 : index
    %12 = vector.load %arg7[%11, %c0_11, %c0_12] : memref<2x128x128xf32, #tpu.memory_space<vmem>>, vector<1x128x128xf32>
    %13 = vector.shape_cast %12 : vector<1x128x128xf32> to vector<128x128xf32>
    %14 = arith.index_cast %arg1 : i32 to index
    %c0_13 = arith.constant 0 : index
    %c0_14 = arith.constant 0 : index
    %15 = vector.load %arg8[%14, %c0_13, %c0_14] : memref<2x1x128xf32, #tpu.memory_space<vmem>>, vector<1x1x128xf32>
    %16 = vector.shape_cast %15 : vector<1x1x128xf32> to vector<1x128xf32>
    %c0_15 = arith.constant 0 : index
    %c0_16 = arith.constant 0 : index
    %17 = vector.load %arg9[%c0_15, %c0_16] : memref<1x128xf32, #tpu.memory_space<vmem>>, vector<1x128xf32>
    %c0_17 = arith.constant 0 : index
    %c0_18 = arith.constant 0 : index
    %18 = vector.load %arg10[%c0_17, %c0_18] : memref<1x128xf32, #tpu.memory_space<vmem>>, vector<1x128xf32>
    %19 = vector.shape_cast %0 : vector<1x8x128xf32> to vector<8x128xf32>
    %cst = arith.constant dense<0.000000e+00> : vector<8x8xf32>
    %20 = tpu.matmul %19, %4, %cst {dimension_numbers = #tpu.dot_dimension_numbers<[1], [0], [0], [1], [0, 0, 1, 1], [], []>} : vector<8x128xf32>, vector<128x8xf32>, vector<8x8xf32> -> vector<8x8xf32>
    %21 = vector.shape_cast %20 : vector<8x8xf32> to vector<1x8x8xf32>
    %22 = vector.shape_cast %7 : vector<1x8xf32> to vector<1x1x8xf32>
    %23 = vector.broadcast %22 : vector<1x1x8xf32> to vector<1x8x8xf32>
    %24 = arith.addf %21, %23 : vector<1x8x8xf32>
    %cst_19 = arith.constant dense<0xFF800000> : vector<1x8xf32>
    %25 = vector.multi_reduction <maximumf>, %24, %cst_19 [2] : vector<1x8x8xf32> to vector<1x8xf32>
    %26 = vector.shape_cast %25 : vector<1x8xf32> to vector<1x8x1xf32>
    %27 = vector.broadcast %26 : vector<1x8x1xf32> to vector<1x8x8xf32>
    %28 = arith.subf %24, %27 : vector<1x8x8xf32>
    %29 = math.exp %28 : vector<1x8x8xf32>
    %cst_20 = arith.constant dense<0.000000e+00> : vector<1x8xf32>
    %30 = vector.multi_reduction <add>, %29, %cst_20 [2] : vector<1x8x8xf32> to vector<1x8xf32>
    %31 = vector.shape_cast %30 : vector<1x8xf32> to vector<1x8x1xf32>
    %32 = vector.broadcast %31 : vector<1x8x1xf32> to vector<1x8x8xf32>
    %33 = arith.divf %29, %32 : vector<1x8x8xf32>
    %cst_21 = arith.constant dense<0.000000e+00> : vector<1x8xf32>
    %34 = vector.multi_reduction <add>, %33, %cst_21 [1] : vector<1x8x8xf32> to vector<1x8xf32>
    %35 = vector.shape_cast %34 : vector<1x8xf32> to vector<1x1x8xf32>
    %36 = vector.broadcast %35 : vector<1x1x8xf32> to vector<1x8x8xf32>
    %37 = arith.divf %33, %36 : vector<1x8x8xf32>
    %cst_22 = arith.constant dense<0.000000e+00> : vector<1x8x128xf32>
    %38 = tpu.matmul %37, %0, %cst_22 {dimension_numbers = #tpu.dot_dimension_numbers<[1], [1], [2], [2], [0, 0, 0, 2, 1, 2], [0], [0]>} : vector<1x8x8xf32>, vector<1x8x128xf32>, vector<1x8x128xf32> -> vector<1x8x128xf32>
    %39 = vector.shape_cast %38 : vector<1x8x128xf32> to vector<8x128xf32>
    %cst_23 = arith.constant dense<0.000000e+00> : vector<8x128xf32>
    %40 = tpu.matmul %39, %10, %cst_23 {dimension_numbers = #tpu.dot_dimension_numbers<[1], [0], [0], [1], [0, 0, 1, 1], [], []>} : vector<8x128xf32>, vector<128x128xf32>, vector<8x128xf32> -> vector<8x128xf32>
    %41 = vector.shape_cast %40 : vector<8x128xf32> to vector<1x8x128xf32>
    %cst_24 = arith.constant dense<0.000000e+00> : vector<1x1x128xf32>
    %42 = tpu.matmul %1, %13, %cst_24 {dimension_numbers = #tpu.dot_dimension_numbers<[2], [0], [0, 1], [1], [0, 0, 0, 1, 1, 1], [], []>} : vector<1x1x128xf32>, vector<128x128xf32>, vector<1x1x128xf32> -> vector<1x1x128xf32>
    %43 = vector.broadcast %42 : vector<1x1x128xf32> to vector<1x8x128xf32>
    %44 = arith.addf %41, %43 : vector<1x8x128xf32>
    %45 = vector.shape_cast %16 : vector<1x128xf32> to vector<1x1x128xf32>
    %46 = vector.broadcast %45 : vector<1x1x128xf32> to vector<1x8x128xf32>
    %47 = arith.addf %44, %46 : vector<1x8x128xf32>
    %cst_25 = arith.constant 0.000000e+00 : f32
    %48 = vector.broadcast %cst_25 : f32 to vector<1x8x128xf32>
    %49 = arith.cmpf ogt, %47, %48 : vector<1x8x128xf32>
    %cst_26 = arith.constant 0.000000e+00 : f32
    %50 = vector.broadcast %cst_26 : f32 to vector<1x8x128xf32>
    %51 = arith.minimumf %47, %50 : vector<1x8x128xf32>
    %52 = math.exp %51 : vector<1x8x128xf32>
    %cst_27 = arith.constant 1.000000e+00 : f32
    %53 = vector.broadcast %cst_27 : f32 to vector<1x8x128xf32>
    %54 = arith.subf %52, %53 : vector<1x8x128xf32>
    %55 = arith.select %49, %47, %54 : vector<1x8x128xi1>, vector<1x8x128xf32>
    %cst_28 = arith.constant dense<0.000000e+00> : vector<1x8xf32>
    %56 = vector.multi_reduction <add>, %55, %cst_28 [2] : vector<1x8x128xf32> to vector<1x8xf32>
    %57 = vector.shape_cast %56 : vector<1x8xf32> to vector<1x8x1xf32>
    %cst_29 = arith.constant 1.280000e+02 : f32
    %58 = vector.broadcast %cst_29 : f32 to vector<1x8x1xf32>
    %59 = arith.divf %57, %58 : vector<1x8x1xf32>
    %60 = vector.broadcast %59 : vector<1x8x1xf32> to vector<1x8x128xf32>
    %61 = arith.subf %55, %60 : vector<1x8x128xf32>
    %62 = vector.broadcast %59 : vector<1x8x1xf32> to vector<1x8x128xf32>
    %63 = arith.subf %55, %62 : vector<1x8x128xf32>
    %64 = arith.mulf %61, %63 : vector<1x8x128xf32>
    %cst_30 = arith.constant dense<0.000000e+00> : vector<1x8xf32>
    %65 = vector.multi_reduction <add>, %64, %cst_30 [2] : vector<1x8x128xf32> to vector<1x8xf32>
    %66 = vector.shape_cast %65 : vector<1x8xf32> to vector<1x8x1xf32>
    %cst_31 = arith.constant 1.280000e+02 : f32
    %67 = vector.broadcast %cst_31 : f32 to vector<1x8x1xf32>
    %68 = arith.divf %66, %67 : vector<1x8x1xf32>
    %69 = vector.broadcast %59 : vector<1x8x1xf32> to vector<1x8x128xf32>
    %70 = arith.subf %55, %69 : vector<1x8x128xf32>
    %cst_32 = arith.constant 9.99999974E-6 : f32
    %71 = vector.broadcast %cst_32 : f32 to vector<1x8x1xf32>
    %72 = arith.addf %68, %71 : vector<1x8x1xf32>
    %73 = math.rsqrt %72 : vector<1x8x1xf32>
    %74 = vector.broadcast %73 : vector<1x8x1xf32> to vector<1x8x128xf32>
    %75 = arith.mulf %70, %74 : vector<1x8x128xf32>
    %76 = vector.shape_cast %17 : vector<1x128xf32> to vector<1x1x128xf32>
    %77 = vector.broadcast %76 : vector<1x1x128xf32> to vector<1x8x128xf32>
    %78 = arith.mulf %75, %77 : vector<1x8x128xf32>
    %79 = vector.shape_cast %18 : vector<1x128xf32> to vector<1x1x128xf32>
    %80 = vector.broadcast %79 : vector<1x1x128xf32> to vector<1x8x128xf32>
    %81 = arith.addf %78, %80 : vector<1x8x128xf32>
    %c0_i32 = arith.constant 0 : i32
    %82 = arith.cmpi eq, %arg1, %c0_i32 : i32
    %83 = arith.extui %82 : i1 to i32
    %c0_i32_33 = arith.constant 0 : i32
    %84 = arith.cmpi ne, %83, %c0_i32_33 : i32
    scf.if %84 {
      %cst_41 = arith.constant 0.000000e+00 : f32
      %91 = vector.broadcast %cst_41 : f32 to vector<1x8x128xf32>
      %c0_42 = arith.constant 0 : index
      %c0_43 = arith.constant 0 : index
      %c0_44 = arith.constant 0 : index
      %92 = vector.load %arg11[%c0_42, %c0_43, %c0_44] : memref<1x8x128xf32, #tpu.memory_space<vmem>>, vector<1x8x128xf32>
      tpu.vector_store %arg11[%c0_42, %c0_43, %c0_44], %91 {strides = array<i32>} : memref<1x8x128xf32, #tpu.memory_space<vmem>>, vector<1x8x128xf32>,
    } else {
    }
    %c0_34 = arith.constant 0 : index
    %c0_35 = arith.constant 0 : index
    %c0_36 = arith.constant 0 : index
    %85 = vector.load %arg11[%c0_34, %c0_35, %c0_36] : memref<1x8x128xf32, #tpu.memory_space<vmem>>, vector<1x8x128xf32>
    %86 = arith.addf %85, %81 : vector<1x8x128xf32>
    %c0_37 = arith.constant 0 : index
    %c0_38 = arith.constant 0 : index
    %c0_39 = arith.constant 0 : index
    %87 = vector.load %arg11[%c0_37, %c0_38, %c0_39] : memref<1x8x128xf32, #tpu.memory_space<vmem>>, vector<1x8x128xf32>
    tpu.vector_store %arg11[%c0_37, %c0_38, %c0_39], %86 {strides = array<i32>} : memref<1x8x128xf32, #tpu.memory_space<vmem>>, vector<1x8x128xf32>,
    %c1_i32 = arith.constant 1 : i32
    %88 = arith.cmpi eq, %arg1, %c1_i32 : i32
    %89 = arith.extui %88 : i1 to i32
    %c0_i32_40 = arith.constant 0 : i32
    %90 = arith.cmpi ne, %89, %c0_i32_40 : i32
    scf.if %90 {
      %c0_41 = arith.constant 0 : index
      %c0_42 = arith.constant 0 : index
      %c0_43 = arith.constant 0 : index
      %91 = vector.load %arg11[%c0_41, %c0_42, %c0_43] : memref<1x8x128xf32, #tpu.memory_space<vmem>>, vector<1x8x128xf32>
      %cst_44 = arith.constant 5.000000e-01 : f32
      %92 = vector.broadcast %cst_44 : f32 to vector<1x8x128xf32>
      %93 = arith.mulf %91, %92 : vector<1x8x128xf32>
      %c0_45 = arith.constant 0 : index
      %c0_46 = arith.constant 0 : index
      %c0_47 = arith.constant 0 : index
      %94 = vector.load %arg11[%c0_45, %c0_46, %c0_47] : memref<1x8x128xf32, #tpu.memory_space<vmem>>, vector<1x8x128xf32>
      tpu.vector_store %arg11[%c0_45, %c0_46, %c0_47], %93 {strides = array<i32>} : memref<1x8x128xf32, #tpu.memory_space<vmem>>, vector<1x8x128xf32>,
    } else {
    }
    return
  }
  func.func @transform_0(%arg0: i32, %arg1: i32) -> (i32, i32, i32) {
    %c0_i32 = arith.constant 0 : i32
    %c0_i32_0 = arith.constant 0 : i32
    %c0_i32_1 = arith.constant 0 : i32
    return %arg0, %c0_i32, %c0_i32_0 : i32, i32, i32
  }
  func.func @transform_1(%arg0: i32, %arg1: i32) -> (i32, i32, i32) {
    %c0_i32 = arith.constant 0 : i32
    %c0_i32_0 = arith.constant 0 : i32
    %c0_i32_1 = arith.constant 0 : i32
    return %arg0, %c0_i32, %c0_i32_0 : i32, i32, i32
  }
  func.func @transform_2(%arg0: i32, %arg1: i32) -> (i32, i32, i32) {
    %c0_i32 = arith.constant 0 : i32
    %c0_i32_0 = arith.constant 0 : i32
    %c0_i32_1 = arith.constant 0 : i32
    %c0_i32_2 = arith.constant 0 : i32
    return %c0_i32, %c0_i32_0, %c0_i32_1 : i32, i32, i32
  }
  func.func @transform_3(%arg0: i32, %arg1: i32) -> (i32, i32, i32) {
    %c0_i32 = arith.constant 0 : i32
    %c0_i32_0 = arith.constant 0 : i32
    %c0_i32_1 = arith.constant 0 : i32
    %c0_i32_2 = arith.constant 0 : i32
    return %c0_i32, %c0_i32_0, %c0_i32_1 : i32, i32, i32
  }
  func.func @transform_4(%arg0: i32, %arg1: i32) -> (i32, i32, i32) {
    %c0_i32 = arith.constant 0 : i32
    %c0_i32_0 = arith.constant 0 : i32
    %c0_i32_1 = arith.constant 0 : i32
    %c0_i32_2 = arith.constant 0 : i32
    return %c0_i32, %c0_i32_0, %c0_i32_1 : i32, i32, i32
  }
  func.func @transform_5(%arg0: i32, %arg1: i32) -> (i32, i32, i32) {
    %c0_i32 = arith.constant 0 : i32
    %c0_i32_0 = arith.constant 0 : i32
    %c0_i32_1 = arith.constant 0 : i32
    %c0_i32_2 = arith.constant 0 : i32
    return %c0_i32, %c0_i32_0, %c0_i32_1 : i32, i32, i32
  }
  func.func @transform_6(%arg0: i32, %arg1: i32) -> (i32, i32, i32) {
    %c0_i32 = arith.constant 0 : i32
    %c0_i32_0 = arith.constant 0 : i32
    %c0_i32_1 = arith.constant 0 : i32
    %c0_i32_2 = arith.constant 0 : i32
    return %c0_i32, %c0_i32_0, %c0_i32_1 : i32, i32, i32
  }
  func.func @transform_7(%arg0: i32, %arg1: i32) -> (i32, i32) {
    %c0_i32 = arith.constant 0 : i32
    %c0_i32_0 = arith.constant 0 : i32
    %c0_i32_1 = arith.constant 0 : i32
    return %c0_i32, %c0_i32_0 : i32, i32
  }
  func.func @transform_8(%arg0: i32, %arg1: i32) -> (i32, i32) {
    %c0_i32 = arith.constant 0 : i32
    %c0_i32_0 = arith.constant 0 : i32
    %c0_i32_1 = arith.constant 0 : i32
    return %c0_i32, %c0_i32_0 : i32, i32
  }
  func.func @transform_9(%arg0: i32, %arg1: i32) -> (i32, i32, i32) {
    %c0_i32 = arith.constant 0 : i32
    %c0_i32_0 = arith.constant 0 : i32
    %c0_i32_1 = arith.constant 0 : i32
    return %arg0, %c0_i32, %c0_i32_0 : i32, i32, i32
  }
}

</mosaic_0001>

<bundles_post_ra>
// kernel: tpu_custom_call.1
= control target key start
LH: loop header
LB: loop body
LE: loop exit
PB: predicated region body
PF: predicated region fallthrough
CT: control target
= control target key end

     0   :  { %14 = vsyncpa [#allocation3], 0  ;;  %s1782_s0 = inlined_call_operand.vmem [shape: f32[2,8,128], index: 0, kind: input, shape index: {}]   ;;  %s1783_s1 = inlined_call_operand.vmem [shape: f32[2,1,128], index: 1, kind: input, shape index: {}]   ;;  %s1784_s2 = inlined_call_operand.vmem [shape: f32[2,128,8], index: 2, kind: input, shape index: {}]   ;;  %s1785_s3 = inlined_call_operand.vmem [shape: f32[2,1,8], index: 3, kind: input, shape index: {}]   ;;  %s1786_s4 = inlined_call_operand.vmem [shape: f32[2,128,128], index: 4, kind: input, shape index: {}]   ;;  %s1787_s5 = inlined_call_operand.hbm [shape: f32[2,128,128], index: 5, kind: input, shape index: {}]   ;;  %s1788_s6 = inlined_call_operand.vmem [shape: f32[2,1,128], index: 6, kind: input, shape index: {}]   ;;  %s1789_s7 = inlined_call_operand.vmem [shape: f32[1,128], index: 7, kind: input, shape index: {}]   ;;  %s1790_s8 = inlined_call_operand.vmem [shape: f32[1,128], index: 8, kind: input, shape index: {}]   ;;  %s1791_s9 = inlined_call_operand.hbm [shape: f32[2,8,128], index: 9, kind: output, shape index: {}]  }
   0x1   :  { %15 = vsyncpa [#allocation4], 0 }
   0x2   :  { %17 = vsyncpa [#allocation4 + $0x1], 0  ;;  %s1485_s30 = smov 0   ;;  %s1487_s10 = smov 0  }
   0x3   :  { %s1489_s11 = smov 0   ;;  %s1491_s12 = smov 0  }
   0x4   :  { %s1493_s13 = smov 0   ;;  %s1495_s14 = smov 0  }
   0x5   :  { %s1497_s15 = smov 0   ;;  %s1499_s16 = smov 0  }
   0x6 LB: > { %1799 = sst [smem:[#allocation8_spill]] %s1417_s14  ;;  %s944_s17 = sadd.s32 4294967295, %s1425_s16   ;;  %s1425_s16 = sphi %s1499_s16, %s23_s16   ;;  %s1421_s15 = sphi %s1497_s15, %s1815_s15   ;;  %s1417_s14 = sphi %s1495_s14, %s1814_s14   ;;  %s1413_s13 = sphi %s1493_s13, %s1813_s13   ;;  %s1409_s12 = sphi %s1491_s12, %s1812_s12   ;;  %s1405_s11 = sphi %s1489_s11, %s1818_s11   ;;  %s1401_s10 = sphi %s1487_s10, %s1817_s10   ;;  %s1397_s30 = sphi %s1485_s30, %s1816_s30  }
   0x7   : > { %1800 = sst [smem:[#allocation9_spill]] %s1421_s15  ;;  %s945_s18 = sadd.s32 4294967294, %s1425_s16  }
   0x8   : > { %s32_s19 = sadd.s32 1, %s1417_s14  ;;  %s35_s20 = sadd.s32 1, %s1421_s15 }
   0x9   : > { %p33_p0 = scmp.ge.s32.totalorder %s32_s19, 2  ;;  %s241_s21 = sadd.s32 1, %s1405_s11 }
   0xa   : > { %p251_p1 = scmp.ne.s32.totalorder %s1405_s11, %s1401_s10  ;;  %p252_p2 = scmp.eq.s32.totalorder %s944_s17, 3 }
   0xb   : > { %s1820_s19 = smov (%p33_p0, %s32_s19), 0  ;;  %s1822_s20 = smov (!%p33_p0, %s35_s20), %s1421_s15 }
   0xc   : > { %1801 = sst [smem:[#allocation10_spill]] %s1820_s19  ;;  %p1535_p3 = por %p252_p2, %p251_p1 }
   0xd   : > { %p257_p4 = scmp.ne.s32.totalorder %s1401_s10, %s1397_s30  ;;  %p37_p5 = scmp.ge.s32.totalorder %s1822_s20, 2 }
   0xe   : > { %s1802_s22 = scalar_select %p1535_p3, 1, 0 }
   0xf   : > { %p258_p6 = scmp.eq.s32.totalorder %s945_s18, 3  ;;  %p946_p7 = scmp.ge.s32.totalorder %s1425_s16, 1 }
  0x10   : > { %p265_p8 = scmp.lt.s32.totalorder %s1425_s16, 5  ;;  %s1824_s20 = smov (%p37_p5, %s1822_s20), 0 }
  0x11   : > { %1803 = sst [smem:[#allocation11_spill]] %s1824_s20  ;;  %p1545_p9 = por %p258_p6, %p257_p4 }
  0x12   : > { %p1549_p10 = pnand %p946_p7, %p265_p8  ;;  %s238_s25 = ssub.s32 %s1421_s15, %s1824_s20 }
  0x13   : > { %s1804_s23 = scalar_select %p1545_p9, 1, 0 }
  0x14   : > { %s1805_s24 = scalar_select %p1549_p10, 1, 0 }
  0x15   : > { %p239_p11 = scmp.eq.s32.totalorder %s238_s25, 0  ;;  %p1207_p12 = pneg %p1549_p10 }
  0x16   : > { %p1557_p13 = scmp.eq.s32.totalorder %s944_s17, 0  ;;  %s1427_s28 = smov [#allocation2]  }
  0x17   : > { %s1562_s27 = scalar_select %p239_p11, %s1405_s11, %s241_s21  }
  0x18   : > { %s1806_s26 = scalar_select %p1557_p13, 1, 0 }
  0x19   : > { %s286_s29 = sshll.u32 %s1427_s28, 4  ;;  %p1566_p0 = pnand %p1557_p13, %p1207_p12  ;;  %s287_s29 = int_to_ptr.vmem [resolvable:$true] %s286_s29 }
  0x1a   : > { %s1299_s19 = scalar_lea.hbm %s1787_s5, 4096 }
  0x1b   : > { %p1300_p1 = scmp.ne.s32.totalorder %s1787_s5, %s1299_s19  ;;  %p1301_p2 = pneg %p1566_p0 }
  0x1c   : > { %p1306_p6 = scmp.lt.u32.totalorder %s1299_s19, %s1787_s5 }
  0x1d   : > { %p1302_p4 = pnand %p1301_p2, %p1300_p1 }
  0x1f   : > { %p1303_p5 = pneg %p1302_p4 }
  0x21   : > { %p1308_p7 = pnand %p1306_p6, %p1303_p5 }
  0x23   : > { %1311 = shalt.err (!%p1308_p7)
}
  0x24   : > { %s1312_s14 = scalar_lea.vmem %s287_s29, 4096  ;;  %p1320_p9 = scmp.lt.s32.totalorder %s287_s29, %s287_s29 }
  0x25   : > { %p1313_p8 = scmp.ne.s32.totalorder %s287_s29, %s1312_s14  ;;  %p1321_p3 = scmp.lt.s32.totalorder %s1312_s14, %s1312_s14 }
  0x27   : > { %p1315_p11 = pnand %p1313_p8, %p1301_p2  ;;  %p1322_p13 = por %p1321_p3, %p1320_p9 }
  0x29   : > { %p1316_p12 = pneg %p1315_p11 }
  0x2b   : > { %p1323_p10 = pnand %p1322_p13, %p1316_p12 }
  0x2d   : > { %1326 = shalt.err (!%p1323_p10)
}
  0x2e   : > { %s1428_s15 = smov 128   ;;  %s1429_s20 = smov 8  }
  0x2f   : > { %1210 = dma.hbm_to_vmem [thread:$0]  (!%p1566_p0), %s1787_s5, 4096, %s287_s29, [#allocation3], %s1428_s15, %s1428_s15, %s1429_s20  }
  0x30   : > { %p1808_p1 = scmp.ne.s32.totalorder %s1805_s24, 0 }
  0x31   : > { %p1809_p4 = scmp.ne.s32.totalorder (!%p1808_p1), %s1806_s26, 0 }
  0x32   : > { %324 = sbr.rel (%p1808_p1) target bundleno = 1573 (0x625), region = 56 }
  0x39   : > { %1388 = dma.done.wait (%p1809_p4), [#allocation3], 4096  }
  0x3a   : > { %1390 = vsyncadd (%p1809_p4), [#allocation3], 4294963200  ;;  %s359_s14 = sand.u32 1, %s1401_s10   ;;  %v1430_v0 = vmov 0.0|0.0   ;;  %s1599_s24 = sshll.u32 %s1409_s12, 7  ;;  %vm1431_vm0 = vmmov 0  }
  0x3b   : > { %s1595_s19 = sshll.u32 %s359_s14, 3  ;;  %1129 = vmatprep.subr.bf16.mxu0 %v1430_v0  ;;  %v1432_v1 = vmov 0.0   ;;  %p362_p3 = scmp.lt.s32.totalorder %s1413_s13, 1  ;;  %vm506_vm1 = vcmask 64512  }
  0x3c   : > { %1051 = vmatprep.mubr.msk.f32.mxu0 %vm1431_vm0, %v1432_v1  ;;  %1054 = vmatprep.subr.mxu1 %v1432_v1  ;;  %s1611_s18 = scalar_lea.vmem %s1784_s2, %s1599_s24  ;;  %s389_s29 = scalar_lea.vmem %s1785_s3, %s1409_s12 }
  0x3d   : > { %1056 = vmatprep.mubr.msk.f32.mxu1 %vm1431_vm0, %v1432_v1  ;;  %s1614_s21 = scalar_select %p362_p3, %s1413_s13, 1  ;;  %v373_v2 = vld [vmem:[%s1611_s18] sm:$0xff]  ;;  %v374_v3 = vld [vmem:[%s1611_s18 + $0x8] sm:$0xff]  ;;  %v375_v4 = vld [vmem:[%s1611_s18 + $0x10] sm:$0xff] }
  0x3e   : > { %v1130_v5 = vpack.c.bf16 %v374_v3, %v373_v2  ;;  %v376_v6 = vld [vmem:[%s1611_s18 + $0x18] sm:$0xff]  ;;  %v377_v8 = vld [vmem:[%s1611_s18 + $0x20] sm:$0xff]  ;;  %v378_v9 = vld [vmem:[%s1611_s18 + $0x28] sm:$0xff]  ;;  %s1688_s26 = scalar_lea.vmem %s1786_s4, %s1599_s24  ;;  %p960_p9 = scmp.ne.s32.totalorder %s1409_s12, 0 }
  0x3f   : > { %s952_s28 = sshll.u32 %s1614_s21, 3  ;;  %v1133_v7 = vpack.c.bf16 %v376_v6, %v375_v4  ;;  %v1136_v11 = vpack.c.bf16 %v378_v9, %v377_v8  ;;  %v379_v12 = vld [vmem:[%s1611_s18 + $0x30] sm:$0xff]  ;;  %v380_v13 = vld [vmem:[%s1611_s18 + $0x38] sm:$0xff]  ;;  %v381_v15 = vld [vmem:[%s1611_s18 + $0x40] sm:$0xff]  ;;  %s368_s20 = scalar_lea.vmem %s1783_s1, %s1614_s21 }
  0x40   : > { %s365_s25 = scalar_lea.vmem %s1782_s0, %s952_s28  ;;  %1131 = vmatpush3.bf16.msra.mxu0 %v1130_v5  ;;  %v1139_v14 = vpack.c.bf16 %v380_v13, %v379_v12  ;;  %v382_v16 = vld [vmem:[%s1611_s18 + $0x48] sm:$0xff]  ;;  %v383_v18 = vld [vmem:[%s1611_s18 + $0x50] sm:$0xff]  ;;  %v384_v19 = vld [vmem:[%s1611_s18 + $0x58] sm:$0xff] }
  0x41   : > { %1132 = vmatprep.subr.bf16.mxu0 %v1430_v0  ;;  %v369_v10 = vld [vmem:[%s365_s25] sm:$0xff]  ;;  %v1142_v17 = vpack.c.bf16 %v382_v16, %v381_v15  ;;  %v1145_v20 = vpack.c.bf16 %v384_v19, %v383_v18  ;;  %v386_v22 = vld [vmem:[%s1611_s18 + $0x68] sm:$0xff]  ;;  %v387_v24 = vld [vmem:[%s1611_s18 + $0x70] sm:$0xff]  ;;  %s361_s25 = scalar_lea.vmem [#allocation5], %s1595_s19 }
  0x42   : > { %1055 = vmatpush3.msra.mxu1 %v369_v10  ;;  %v385_v21 = vld [vmem:[%s1611_s18 + $0x60] sm:$0xff]  ;;  %v388_v25 = vld [vmem:[%s1611_s18 + $0x78] sm:$0xff]  ;;  %s1655_s18 = scalar_lea.vmem [#allocation2], %s1599_s24  ;;  %v393_v13 = vld [vmem:[%s1688_s26 + $0x8] sm:$0xff] }
  0x43   : > { %1153 = vmatprep.subr.bf16.mxu1 %v1430_v0  ;;  %v1148_v23 = vpack.c.bf16 %v386_v22, %v385_v21  ;;  %v1151_v26 = vpack.c.bf16 %v388_v25, %v387_v24  ;;  %v954_v27 = vld [vmem:[%s389_s29] ss:$0 sm:$0xff]  ;;  %v410_v50 = vld [vmem:[%s1655_s18 + $0x8] sm:$0xff]  ;;  %v411_v52 = vld [vmem:[%s1655_s18 + $0x10] sm:$0xff]  ;;  %s425_s29 = scalar_lea.vmem %s1788_s6, %s1409_s12 }
  0x44   : > { %1134 = vmatpush3.bf16.msra.mxu0 %v1133_v7  ;;  %v409_v49 = vld [vmem:[%s1655_s18] sm:$0xff]  ;;  %v412_v53 = vld [vmem:[%s1655_s18 + $0x18] sm:$0xff]  ;;  %v414_v56 = vld [vmem:[%s1655_s18 + $0x28] sm:$0xff] }
  0x45   : > { %1135 = vmatprep.subr.bf16.mxu0 %v1430_v0  ;;  %v1178_v51 = vpack.c.bf16 %v410_v50, %v409_v49  ;;  %v1181_v54 = vpack.c.bf16 %v412_v53, %v411_v52  ;;  %v413_v55 = vld [vmem:[%s1655_s18 + $0x20] sm:$0xff]  ;;  %v415_v58 = vld [vmem:[%s1655_s18 + $0x30] sm:$0xff]  ;;  %v416_v59 = vld [vmem:[%s1655_s18 + $0x38] sm:$0xff] }
  0x46   : > { %v1184_v57 = vpack.c.bf16 %v414_v56, %v413_v55  ;;  %v1187_v60 = vpack.c.bf16 %v416_v59, %v415_v58  ;;  %v417_v61 = vld [vmem:[%s1655_s18 + $0x40] sm:$0xff]  ;;  %v418_v62 = vld [vmem:[%s1655_s18 + $0x48] sm:$0xff]  ;;  %v419_v2 = vld [vmem:[%s1655_s18 + $0x50] sm:$0xff] }
  0x47   : > { %v1190_v63 = vpack.c.bf16 %v418_v62, %v417_v61  ;;  %v420_v3 = vld [vmem:[%s1655_s18 + $0x58] sm:$0xff]  ;;  %v421_v5 = vld [vmem:[%s1655_s18 + $0x60] sm:$0xff]  ;;  %v422_v6 = vld [vmem:[%s1655_s18 + $0x68] sm:$0xff] }
  0x48   : > { %1137 = vmatpush3.bf16.msra.mxu0 %v1136_v11  ;;  %v1193_v4 = vpack.c.bf16 %v420_v3, %v419_v2  ;;  %v1196_v7 = vpack.c.bf16 %v422_v6, %v421_v5  ;;  %v423_v8 = vld [vmem:[%s1655_s18 + $0x70] sm:$0xff]  ;;  %v424_v9 = vld [vmem:[%s1655_s18 + $0x78] sm:$0xff]  ;;  %v370_v11 = vld [vmem:[%s368_s20] sm:$0x1] }
  0x49   : > { %1138 = vmatprep.subr.bf16.mxu0 %v1430_v0  ;;  %v392_v12 = vld [vmem:[%s1688_s26] sm:$0xff]  ;;  %v394_v15 = vld [vmem:[%s1688_s26 + $0x10] sm:$0xff]  ;;  %v395_v16 = vld [vmem:[%s1688_s26 + $0x18] sm:$0xff] }
  0x4a   : > { %v1157_v18 = vpack.c.bf16 %v395_v16, %v394_v15  ;;  %v396_v19 = vld [vmem:[%s1688_s26 + $0x20] sm:$0xff]  ;;  %v398_v22 = vld [vmem:[%s1688_s26 + $0x30] sm:$0xff]  ;;  %v401_v25 = vld [vmem:[%s1688_s26 + $0x48] sm:$0xff] }
  0x4b   : > { %v958_v61 = vld [vmem:[%s1789_s7] ss:$0 sm:$0xff] }
  0x4c   : > { %1140 = vmatpush3.bf16.msra.mxu0 %v1139_v14  ;;  %v1154_v14 = vpack.c.bf16 %v393_v13, %v392_v12 }
  0x4d   : > { %1141 = vmatprep.subr.bf16.mxu0 %v1430_v0 }
  0x50   : > { %1143 = vmatpush3.bf16.msra.mxu0 %v1142_v17 }
  0x51   : > { %1144 = vmatprep.subr.bf16.mxu0 %v1430_v0 }
  0x54   : > { %1146 = vmatpush3.bf16.msra.mxu0 %v1145_v20  ;;  %v397_v20 = vld [vmem:[%s1688_s26 + $0x28] sm:$0xff] }
  0x55   : > { %1147 = vmatprep.subr.bf16.mxu0 %v1430_v0  ;;  %v1160_v21 = vpack.c.bf16 %v397_v20, %v396_v19 }
  0x58   : > { %1149 = vmatpush3.bf16.msra.mxu0 %v1148_v23  ;;  %v399_v23 = vld [vmem:[%s1688_s26 + $0x38] sm:$0xff] }
  0x59   : > { %1150 = vmatprep.subr.bf16.mxu0 %v1430_v0  ;;  %v1163_v24 = vpack.c.bf16 %v399_v23, %v398_v22 }
  0x5c   : > { %1152 = vmatpush3.bf16.msra.mxu0 %v1151_v26 }
  0x5d   : > { %1177 = vmatprep.subr.bf16.mxu0 %v1430_v0 }
  0x5f   : > { %1052 = vmatmul.mubr.f32.vlgmr.msra.gmra.mrb[0].mxu0 %v369_v10  ;;  %v1199_v10 = vpack.c.bf16 %v424_v9, %v423_v8 }
  0x60   : > { %1126 = vmatprep.mubr.msk.f32.mxu0 %vm1431_vm0, %v1432_v1  ;;  %1179 = vmatpush3.bf16.msra.mxu0 %v1178_v51 }
  0x61   : > { %1180 = vmatprep.subr.bf16.mxu0 %v1430_v0 }
  0x64   : > { %1182 = vmatpush3.bf16.msra.mxu0 %v1181_v54 }
  0x65   : > { %1183 = vmatprep.subr.bf16.mxu0 %v1430_v0 }
  0x68   : > { %1185 = vmatpush3.bf16.msra.mxu0 %v1184_v57 }
  0x69   : > { %1186 = vmatprep.subr.bf16.mxu0 %v1430_v0 }
  0x6c   : > { %1188 = vmatpush3.bf16.msra.mxu0 %v1187_v60 }
  0x6d   : > { %1189 = vmatprep.subr.bf16.mxu0 %v1430_v0 }
  0x70   : > { %1191 = vmatpush3.bf16.msra.mxu0 %v1190_v63  ;;  %v959_v63 = vld [vmem:[%s1790_s8] ss:$0 sm:$0xff] }
  0x71   : > { %1192 = vmatprep.subr.bf16.mxu0 %v1430_v0 }
  0x74   : > { %1194 = vmatpush3.bf16.msra.mxu0 %v1193_v4  ;;  %v1433_v4 = vmov (!%p960_p9), 0.0  }
  0x75   : > { %1195 = vmatprep.subr.bf16.mxu0 %v1430_v0  ;;  %820 = vst [vmem:[%s361_s25] sm:$0xff] (!%p960_p9), %v1433_v4 }
  0x78   : > { %1197 = vmatpush3.bf16.msra.mxu0 %v1196_v7 }
  0x79   : > { %1198 = vmatprep.subr.bf16.mxu0 %v1430_v0 }
  0x7c   : > { %1200 = vmatpush3.bf16.msra.mxu0 %v1199_v10 }
  0x7f   : > { %1127 = vmatmul.mubr.f32.vlgmr.msra.gmra.mrb[2].mxu0 %v370_v11 }
 0x132   : > { %v495_v28 = vpop.f32.mrb[0].mxu0 }
 0x133   : > { %v505_v29 = vadd.f32 %v954_v27, %v495_v28  ;;  %v1053_v30 = vpop.f32.mrb[1].mxu0  ;;  %v402_v27 = vld [vmem:[%s1688_s26 + $0x50] sm:$0xff]  ;;  %v403_v28 = vld [vmem:[%s1688_s26 + $0x58] sm:$0xff] }
 0x134   : > { %v404_v30 = vld [vmem:[%s1688_s26 + $0x60] sm:$0xff] }
 0x135   : > { %v507_v31 = vsel %vm506_vm1, %v505_v29, -inf }
 0x136   : > { %508 = vmax.xlane.f32.xlu0 %v507_v31  ;;  %v405_v31 = vld [vmem:[%s1688_s26 + $0x68] sm:$0xff] }
 0x1c3   : > { %v509_v32 = vpop.xlane.xlu0 %508 }
 0x1c4   : > { %v510_v33 = vsub.f32 %v505_v29, %v509_v32  ;;  %v1169_v29 = vpack.c.bf16 %v403_v28, %v402_v27  ;;  %v1172_v32 = vpack.c.bf16 %v405_v31, %v404_v30 }
 0x1c6   : > { %v511_v34 = vmul.f32 1.442695, %v510_v33  ;;  %v406_v33 = vld [vmem:[%s1688_s26 + $0x70] sm:$0xff] }
 0x1c8   : > { %1289 = vpow2.f32 %v511_v34  ;;  %v407_v34 = vld [vmem:[%s1688_s26 + $0x78] sm:$0xff] }
 0x1d2   : > { %v1290_v35 = vpop.eup %1289 }
 0x1d3   : > { %v513_v36 = vsel %vm506_vm1, %v1290_v35, 0.0 }
 0x1d4   : > { %514 = vadd.xlane.f32.xlu0 %v513_v36  ;;  %v768_v36 = vpop.f32.mrb[2].mxu0 }
 0x261   : > { %v515_v37 = vpop.xlane.xlu0 %514 }
 0x262   : > { %1291 = vrcp.f32 %v515_v37  ;;  %v1128_v37 = vpop.f32.mrb[3].mxu0 }
 0x26c   : > { %v1292_v38 = vpop.eup %1291 }
 0x26d   : > { %v517_v39 = vmul.f32 %v1292_v38, %v1290_v35  ;;  %v1175_v35 = vpack.c.bf16 %v407_v34, %v406_v33 }
 0x26f   : > { %v518_v40 = vsel %vm506_vm1, %v517_v39, 0.0 }
 0x270   : > { %v519_v41 = vrot.slane %v518_v40, 4 }
 0x272   : > { %v520_v42 = vadd.f32 %v519_v41, %v518_v40  ;;  %v772_v40 = vlaneseq }
 0x274   : > { %v521_v43 = vrot.slane %v520_v42, 2  ;;  %v773_v41 = vshrl.u32 %v772_v40, 7 }
 0x276   : > { %v522_v44 = vadd.f32 %v521_v43, %v520_v42  ;;  %v774_v42 = vsub.s32 0, %v773_v41 }
 0x278   : > { %v523_v45 = vrot.slane %v522_v44, 1  ;;  %v775_v43 = vrot.slane %v768_v36, %v774_v42 }
 0x27a   : > { %v524_v46 = vadd.f32 %v523_v45, %v522_v44  ;;  %v956_v44 = vld [vmem:[%s425_s29] ss:$0 sm:$0xff] }
 0x27c   : > { %1293 = vrcp.f32 %v524_v46 }
 0x286   : > { %v1294_v47 = vpop.eup %1293 }
 0x287   : > { %v526_v48 = vmul.f32 %v1294_v47, %v517_v39 }
 0x289   : > { %527 = vxpose.xlu1.b32.start.end [1/1] (short) (narrow) %v526_v48, 8 }
 0x309   : > { %v543_v17 = vpop.trf.xlu1 }
 0x30a   : > { %1057 = vmatmul.mubr.msk.f32.vlgmr.msra.gmra.mrb[0].mxu1 %vm506_vm1, %v543_v17 }
 0x30b   : > { %1155 = vmatpush3.bf16.msra.mxu1 %v1154_v14  ;;  %1091 = vmatprep.mubr.msk.f32.mxu1 %vm1431_vm0, %v1432_v1  ;;  %v400_v1 = vld [vmem:[%s1688_s26 + $0x40] sm:$0xff] }
 0x30c   : > { %1156 = vmatprep.subr.bf16.mxu1 %v1430_v0  ;;  %v1166_v26 = vpack.c.bf16 %v401_v25, %v400_v1 }
 0x30f   : > { %1158 = vmatpush3.bf16.msra.mxu1 %v1157_v18 }
 0x310   : > { %1159 = vmatprep.subr.bf16.mxu1 %v1430_v0 }
 0x313   : > { %1161 = vmatpush3.bf16.msra.mxu1 %v1160_v21 }
 0x314   : > { %1162 = vmatprep.subr.bf16.mxu1 %v1430_v0 }
 0x317   : > { %1164 = vmatpush3.bf16.msra.mxu1 %v1163_v24 }
 0x318   : > { %1165 = vmatprep.subr.bf16.mxu1 %v1430_v0 }
 0x31b   : > { %1167 = vmatpush3.bf16.msra.mxu1 %v1166_v26 }
 0x31c   : > { %1168 = vmatprep.subr.bf16.mxu1 %v1430_v0 }
 0x31f   : > { %1170 = vmatpush3.bf16.msra.mxu1 %v1169_v29 }
 0x320   : > { %1171 = vmatprep.subr.bf16.mxu1 %v1430_v0 }
 0x323   : > { %1173 = vmatpush3.bf16.msra.mxu1 %v1172_v32 }
 0x324   : > { %1174 = vmatprep.subr.bf16.mxu1 %v1430_v0 }
 0x327   : > { %1176 = vmatpush3.bf16.msra.mxu1 %v1175_v35 }
 0x3dd   : > { %v628_v38 = vpop.f32.mrb[0].mxu1 }
 0x3de   : > { %v1058_v39 = vpop.f32.mrb[1].mxu1  ;;  %1092 = vmatmul.mubr.f32.vlgmr.msra.gmra.mrb[2].mxu1 %v628_v38 }
 0x4b1   : > { %v698_v45 = vpop.f32.mrb[2].mxu1 }
 0x4b2   : > { %v776_v46 = vadd.f32 %v775_v43, %v698_v45  ;;  %v1093_v47 = vpop.f32.mrb[3].mxu1 }
 0x4b4   : > { %v783_v48 = vadd.f32 %v956_v44, %v776_v46 }
 0x4b6   : > { %v785_v0 = vmin.f32 %v783_v48, 0.0  ;;  %vm784_vm2 = vcmp.gt.f32.partialorder %v783_v48, 0.0 }
 0x4b8   : > { %v786_v49 = vmul.f32 1.442695, %v785_v0 }
 0x4ba   : > { %1295 = vpow2.f32 %v786_v49 }
 0x4c4   : > { %v1296_v50 = vpop.eup %1295 }
 0x4c5   : > { %v957_v51 = vadd.f32 -1.0, %v1296_v50 }
 0x4c7   : > { %v789_v52 = vsel %vm784_vm2, %v783_v48, %v957_v51 }
 0x4c8   : > { %790 = vadd.xlane.f32.xlu1 %v789_v52 }
 0x555   : > { %v791_v53 = vpop.xlane.xlu1 %790 }
 0x556   : > { %v793_v54 = vmul.f32 0.0078125, %v791_v53 }
 0x558   : > { %v794_v55 = vsub.f32 %v789_v52, %v793_v54 }
 0x55a   : > { %v795_v56 = vmul.f32 %v794_v55, %v794_v55 }
 0x55c   : > { %796 = vadd.xlane.f32.xlu0 %v795_v56 }
 0x5e9   : > { %v797_v57 = vpop.xlane.xlu0 %796 }
 0x5ea   : > { %v798_v58 = vmul.f32 0.0078125, %v797_v57 }
 0x5ec   : > { %v799_v59 = vadd.f32 1e-05, %v798_v58 }
 0x5ee   : > { %1297 = vrsqrt.f32 %v799_v59 }
 0x5f7   : > { %819 = sbr.rel (%p960_p9) target bundleno = 1534 (0x5fe), region = 64 }
 0x5f8   : > { %v1298_v60 = vpop.eup %1297 }
 0x5f9   : > { %v801_v62 = vmul.f32 %v1298_v60, %v794_v55 }
 0x5fb   : > { %v808_v2 = vmul.f32 %v958_v61, %v801_v62 }
 0x5fd   : > { %v815_v3 = vadd.f32 %v959_v63, %v808_v2 }
 0x5fe PF: > { %v821_v5 = vld [vmem:[%s361_s25] sm:$0xff]  ;;  %p961_p10 = scmp.ne.s32.totalorder %s1409_s12, 1 }
 0x5ff   : > { %v822_v6 = vadd.f32 %v821_v5, %v815_v3 }
 0x600   : > { %827 = sbr.rel (%p961_p10) target bundleno = 1548 (0x60c), region = 68 }
 0x601   : > { %823 = vst [vmem:[%s361_s25] sm:$0xff] %v822_v6 }
 0x608   : > { %v828_v7 = vld [vmem:[%s361_s25] sm:$0xff] }
 0x609   : > { %v829_v8 = vmul.f32 0.5, %v828_v7 }
 0x60b   : > { %830 = vst [vmem:[%s361_s25] sm:$0xff] %v829_v8 }
 0x60c PF: > { %s963_s19 = sshll.u32 %s1413_s13, 7  ;;  %s845_s21 = sshll.u32 %s361_s25, 4  ;;  %s846_s21 = int_to_ptr.vmem [resolvable:$true] %s845_s21 }
 0x60d   : > { %s1733_s24 = scalar_lea.hbm %s1791_s9, %s963_s19  ;;  %s832_s29 = scalar_lea.sflag [#allocation4], %s359_s14 }
 0x60e   : > { %s1327_s18 = scalar_lea.vmem %s846_s21, 128  ;;  %p1810_p0 = scmp.ne.s32.totalorder %s1802_s22, 0 }
 0x60f   : > { %p1328_p13 = scmp.ne.s32.totalorder %s846_s21, %s1327_s18  ;;  %s1434_s12 = smov [#allocation5]  }
 0x610   : > { %s1331_s28 = sshll.u32 %s1434_s12, 4  ;;  %s1332_s28 = int_to_ptr.vmem [resolvable:$false] %s1331_s28 }
 0x611   : > { %p1329_p2 = pnand %p1328_p13, %p1810_p0  ;;  %s1333_s15 = scalar_lea.vmem %s1332_s28, 256 }
 0x612   : > { %p1334_p6 = scmp.lt.s32.totalorder %s846_s21, %s1332_s28  ;;  %p1335_p7 = scmp.lt.s32.totalorder %s1333_s15, %s1327_s18 }
 0x613   : > { %p1330_p5 = pneg %p1329_p2 }
 0x614   : > { %p1336_p8 = por %p1335_p7, %p1334_p6 }
 0x616   : > { %p1337_p11 = pnand %p1336_p8, %p1330_p5 }
 0x618   : > { %1340 = shalt.err (!%p1337_p11)
}
 0x619   : > { %s1341_s13 = scalar_lea.hbm %s1733_s24, 128  ;;  %s1345_s25 = scalar_lea.hbm %s1791_s9, 256 }
 0x61a   : > { %p1342_p12 = scmp.ne.s32.totalorder %s1733_s24, %s1341_s13  ;;  %p1346_p3 = scmp.lt.u32.totalorder %s1733_s24, %s1791_s9 }
 0x61b   : > { %p1347_p9 = scmp.lt.u32.totalorder %s1345_s25, %s1341_s13  ;;  %p1349_p13 = scmp.lt.u32.totalorder %s1341_s13, %s1733_s24 }
 0x61c   : > { %p1343_p1 = pnand %p1342_p12, %p1810_p0 }
 0x61d   : > { %p1348_p10 = por %p1347_p9, %p1346_p3 }
 0x61e   : > { %p1344_p4 = pneg %p1343_p1 }
 0x61f   : > { %p1350_p2 = por %p1349_p13, %p1348_p10 }
 0x621   : > { %p1351_p5 = pnand %p1350_p2, %p1344_p4 }
 0x623   : > { %1354 = shalt.err (!%p1351_p5)
}
 0x624   : > { %1205 = dma.vmem_to_hbm [thread:$0]  (%p1810_p0), %s846_s21, 128, %s1733_s24, %s832_s29  }
 0x625 PF: > { %p1217_p6 = scmp.ge.s32.totalorder %s1425_s16, 2  ;;  %s857_s26 = sand.u32 1, %s1397_s30  }
 0x626   : > { %p1811_p7 = scmp.ne.s32.totalorder %s1804_s23, 0  ;;  %s858_s18 = scalar_lea.sflag [#allocation4], %s857_s26 }
 0x628   : > { %p1212_p8 = pnand %p1217_p6, %p1811_p7 }
 0x62a   : > { %1392 = dma.done.wait (!%p1212_p8), %s858_s18, 128  }
 0x62b   : > { %1394 = vsyncadd (!%p1212_p8), %s858_s18, 4294967168  ;;  %s23_s16 = sadd.s32 1, %s1425_s16   ;;  %s1812_s12 = sld [smem:[#allocation8_spill]] }
 0x62c   : > { %p20_p11 = scmp.ge.s32.totalorder %s23_s16, 6   ;;  %s1813_s13 = sld [smem:[#allocation9_spill]] }
 0x62d   : > { %s1814_s14 = sld [smem:[#allocation10_spill]]  ;;  %s1815_s15 = sld [smem:[#allocation11_spill]] }
 0x62e   : > { %s1816_s30 = smov %s1401_s10  ;;  %s1817_s10 = smov %s1405_s11 }
 0x62f   : > { %s1818_s11 = smov %s1562_s27  ;;  %22 = sbr.rel (!%p20_p11) target bundleno = 6 (0x6), region = 112 }
 0x636   :  { %863 = vsyncpa [#allocation3], 1 }
 0x637   :  { %865 = vsyncpa [#allocation3 + $0x1], 1 }
 0x638   :  { %866 = vsyncpa [#allocation4], 1 }
 0x639   :  { %868 = vsyncpa [#allocation4 + $0x1], 1 }

</bundles_post_ra>
